<compile_context>
chip_gen: v7x
topology: tpu7x:2x2x1
jax: 0.10.0
libtpu: 0.0.40
codegen_flags: <defaults>
</compile_context>

<pallas_src>
import jax
import jax.numpy as jnp
from jax.experimental import pallas as pl
from jax.experimental.pallas import tpu as pltpu


# Total-footprint cutoff (w1 + w2 + out bytes) for the grid-less fast path.
_SMALL_PATH_TOTAL_BYTES = 256 * 1024
_DEFAULT_TILE_BYTES = 4 * 1024 * 1024


def blend_kernel(w1_ref, w2_ref, mask_ref, o_ref):
    # o = w1*m + w2*(1-m)  ==  w2 + m*(w1 - w2)   (one fewer VALU op per vreg)
    # Compute in f32 (mask is the f32 nn.Parameter); cast only at the store.
    m = mask_ref[...].astype(jnp.float32)          # (1, tile_s) -> broadcasts over rows
    w1 = w1_ref[...].astype(jnp.float32)           # (tile_b, tile_s)
    w2 = w2_ref[...].astype(jnp.float32)           # (tile_b, tile_s)
    o_ref[...] = (w2 + m * (w1 - w2)).astype(o_ref.dtype)


def _sublane_multiple(itemsize):
    # Native packed-tile height: 8 rows for 32-bit, 16 for bf16, 32 for int8/fp8.
    return max(8, 32 // max(1, itemsize))


def _choose_tiles(B, S, itemsize, tile_bytes):
    """Pick lane-dense (tile_b, tile_s) under a per-tile byte budget.

    TPU block rule: last dim must be a multiple of 128 or == S; second-to-last
    must be a multiple of the native sublane packing (dtype-aware) or == B.
    """
    sub = _sublane_multiple(itemsize)

    # Feature axis: keep full S if even a minimal-height slab fits the budget;
    # otherwise tile S in multiples of 128 (keeps stores lane-dense, unmasked).
    if S * sub * itemsize <= tile_bytes:
        tile_s = S
    else:
        tile_s = max(128, (tile_bytes // (sub * itemsize)) // 128 * 128)

    # Batch axis: as many rows as the budget allows (multiple of `sub`, or all of B).
    rows = max(1, tile_bytes // (tile_s * itemsize))
    if rows >= B:
        tile_b = B
    else:
        tile_b = max(sub, (rows // sub) * sub)
        if tile_b >= B:            # tiny batch (< sub rows): just take all of it
            tile_b = B

    # If the whole problem landed in a single tile, split the batch 2-way so a
    # 2-TensorCore chip (v7x) can shard the grid across both cores.
    if tile_b == B and tile_s == S and B >= 2 * sub:
        half = -(-B // 2)                       # ceil(B / 2)
        tile_b = -(-half // sub) * sub          # round up to sublane multiple
    return tile_b, tile_s


def fixed_mask_forward(w1, w2, mask, *, tile_bytes=_DEFAULT_TILE_BYTES):
    """w1, w2: (B, S); mask: (S,). Returns w1*mask + w2*(1-mask), shape (B, S)."""
    B, S = w1.shape
    assert w2.shape == (B, S) and mask.shape == (S,)
    itemsize = jnp.dtype(w1.dtype).itemsize
    mask2d = mask.reshape(1, S).astype(jnp.float32)   # keep f32 parameter precision

    cost = pl.CostEstimate(
        flops=3 * B * S,
        transcendentals=0,
        bytes_accessed=3 * B * S * itemsize + S * 4,
    )

    # Small problem: drop the grid entirely -- one step, full-array VMEM blocks.
    if 3 * B * S * itemsize <= _SMALL_PATH_TOTAL_BYTES:
        vmem_spec = pl.BlockSpec(memory_space=pltpu.MemorySpace.VMEM)
        return pl.pallas_call(
            blend_kernel,
            out_shape=jax.ShapeDtypeStruct((B, S), w1.dtype),
            in_specs=[vmem_spec, vmem_spec, vmem_spec],
            out_specs=vmem_spec,
            cost_estimate=cost,
        )(w1, w2, mask2d)

    # Large problem: multi-MiB lane-dense tiles, auto-pipelined (2 buffers).
    tile_b, tile_s = _choose_tiles(B, S, itemsize, tile_bytes)

    # Batch axis innermost so the (1, tile_s) mask block index is unchanged
    # across consecutive grid steps (Pallas skips its re-DMA).
    grid = (pl.cdiv(S, tile_s), pl.cdiv(B, tile_b))

    # Double-buffered footprint: (w1 + w2 + out) tiles x 2 buffers, plus the
    # mask strip and internal scratch headroom.  Explicit so it is auditable
    # and never gated by the per-generation scoped-VMEM default.
    vmem_limit = int(min(6 * tile_b * tile_s * itemsize
                         + 2 * tile_s * 4
                         + (4 << 20),
                         48 << 20))

    return pl.pallas_call(
        blend_kernel,
        out_shape=jax.ShapeDtypeStruct((B, S), w1.dtype),
        grid_spec=pltpu.PrefetchScalarGridSpec(
            num_scalar_prefetch=0,
            grid=grid,
            in_specs=[
                pl.BlockSpec((tile_b, tile_s), lambda j, i: (i, j)),   # w1
                pl.BlockSpec((tile_b, tile_s), lambda j, i: (i, j)),   # w2
                pl.BlockSpec((1, tile_s), lambda j, i: (0, j)),        # mask
            ],
            out_specs=pl.BlockSpec((tile_b, tile_s), lambda j, i: (i, j)),
        ),
        compiler_params=pltpu.CompilerParams(
            dimension_semantics=("parallel", "parallel"),
            vmem_limit_bytes=vmem_limit,
        ),
        cost_estimate=cost,
    )(w1, w2, mask2d)


def _ref(w1, w2, mask):
    m = mask[None, :].astype(jnp.float32)
    return (w1.astype(jnp.float32) * m
            + w2.astype(jnp.float32) * (1.0 - m)).astype(w1.dtype)


if __name__ == "__main__":
    key = jax.random.PRNGKey(0)

    # 1) Module defaults: FixedMaskModel(size=512), batch=8 -> grid-less path.
    SIZE, BATCH = 512, 8
    k_mask, k_w1, k_w2 = jax.random.split(key, 3)
    mask = jax.random.uniform(k_mask, (SIZE,), dtype=jnp.float32)  # nn.init.uniform_
    w1 = jax.random.normal(k_w1, (BATCH, SIZE), dtype=jnp.float32)
    w2 = jax.random.normal(k_w2, (BATCH, SIZE), dtype=jnp.float32)

    out = jax.block_until_ready(fixed_mask_forward(w1, w2, mask))
    assert out.shape == (BATCH, SIZE)
    assert jnp.allclose(out, _ref(w1, w2, mask), atol=1e-5, rtol=1e-5)

    # 2) Tiled (gridded) path with an artificially tiny tile budget.
    B2, S2 = 32, 640
    k_m2, k_a2, k_b2 = jax.random.split(jax.random.PRNGKey(0), 3)
    mask2 = jax.random.uniform(k_m2, (S2,), dtype=jnp.float32)
    a2 = jax.random.normal(k_a2, (B2, S2), dtype=jnp.float32)
    b2 = jax.random.normal(k_b2, (B2, S2), dtype=jnp.float32)
    out2 = jax.block_until_ready(
        fixed_mask_forward(a2, b2, mask2, tile_bytes=32 * 1024))
    assert jnp.allclose(out2, _ref(a2, b2, mask2), atol=1e-5, rtol=1e-5)

    # 3) Mid-size problem: above the gridless cutoff, fits one tile -> 2-way
    #    batch split (both TensorCores on v7x), default 4 MiB tile budget.
    B3, S3 = 64, 1024
    k_m3, k_a3, k_b3 = jax.random.split(jax.random.PRNGKey(1), 3)
    mask3 = jax.random.uniform(k_m3, (S3,), dtype=jnp.float32)
    a3 = jax.random.normal(k_a3, (B3, S3), dtype=jnp.float32)
    b3 = jax.random.normal(k_b3, (B3, S3), dtype=jnp.float32)
    out3 = jax.block_until_ready(fixed_mask_forward(a3, b3, mask3))
    assert jnp.allclose(out3, _ref(a3, b3, mask3), atol=1e-5, rtol=1e-5)

    # 4) bfloat16 weights: exercises dtype-aware sublane tiling + f32 blend.
    a4 = a3.astype(jnp.bfloat16)
    b4 = b3.astype(jnp.bfloat16)
    out4 = jax.block_until_ready(
        fixed_mask_forward(a4, b4, mask3, tile_bytes=64 * 1024))
    assert jnp.allclose(out4.astype(jnp.float32),
                        _ref(a4, b4, mask3).astype(jnp.float32),
                        atol=2e-2, rtol=2e-2)

    print("KERNEL_OK")
</pallas_src>

<mosaic_0001>
module attributes {stable_mosaic.version = 11 : i64} {
  func.func @blend_kernel(%arg0: memref<8x512xf32, #tpu.memory_space<vmem>>, %arg1: memref<8x512xf32, #tpu.memory_space<vmem>>, %arg2: memref<1x512xf32, #tpu.memory_space<vmem>>, %arg3: memref<8x512xf32, #tpu.memory_space<vmem>>) attributes {dimension_semantics = [], scalar_prefetch = 0 : i64, scratch_operands = 0 : i64, tpu.core_type = #tpu.core_type<tc>} {
    %c0 = arith.constant 0 : index
    %c0_0 = arith.constant 0 : index
    %0 = vector.load %arg2[%c0, %c0_0] : memref<1x512xf32, #tpu.memory_space<vmem>>, vector<1x512xf32>
    %c0_1 = arith.constant 0 : index
    %c0_2 = arith.constant 0 : index
    %1 = vector.load %arg0[%c0_1, %c0_2] : memref<8x512xf32, #tpu.memory_space<vmem>>, vector<8x512xf32>
    %c0_3 = arith.constant 0 : index
    %c0_4 = arith.constant 0 : index
    %2 = vector.load %arg1[%c0_3, %c0_4] : memref<8x512xf32, #tpu.memory_space<vmem>>, vector<8x512xf32>
    %3 = arith.subf %1, %2 : vector<8x512xf32>
    %4 = vector.broadcast %0 : vector<1x512xf32> to vector<8x512xf32>
    %5 = arith.mulf %4, %3 : vector<8x512xf32>
    %6 = arith.addf %2, %5 : vector<8x512xf32>
    %c0_5 = arith.constant 0 : index
    %c0_6 = arith.constant 0 : index
    %7 = vector.load %arg3[%c0_5, %c0_6] : memref<8x512xf32, #tpu.memory_space<vmem>>, vector<8x512xf32>
    tpu.vector_store %arg3[%c0_5, %c0_6], %6 {strides = array<i32>} : memref<8x512xf32, #tpu.memory_space<vmem>>, vector<8x512xf32>,
    return
  }
}

</mosaic_0001>

<bundles_post_ra>
// kernel: tpu_custom_call.1
= control target key start
LH: loop header
LB: loop body
LE: loop exit
PB: predicated region body
PF: predicated region fallthrough
CT: control target
= control target key end

     0   :  { %8 = vsyncpa [#allocation3], 0  ;;  %s238_s0 = inlined_call_operand.hbm [shape: f32[8,512], index: 0, kind: input, shape index: {}]   ;;  %s239_s1 = inlined_call_operand.hbm [shape: f32[8,512], index: 1, kind: input, shape index: {}]   ;;  %s240_s2 = inlined_call_operand.vmem [shape: f32[1,512], index: 2, kind: input, shape index: {}]   ;;  %s241_s3 = inlined_call_operand.hbm [shape: f32[8,512], index: 3, kind: output, shape index: {}]  }
   0x1   :  { %9 = vsyncpa [#allocation6], 0 }
   0x2   :  { %10 = vsyncpa [#allocation4], 0  ;;  %s176_s12 = smov [#allocation2]   ;;  %s177_s14 = smov [#allocation5]  }
   0x3   :  { %s17_s13 = sshll.u32 %s176_s12, 4  ;;  %s27_s15 = sshll.u32 %s177_s14, 4  ;;  %s18_s13 = int_to_ptr.vmem [resolvable:$true] %s17_s13  ;;  %s28_s15 = int_to_ptr.vmem [resolvable:$true] %s27_s15 }
   0x4   :  { %s104_s18 = scalar_lea.hbm %s238_s0, 512 }
   0x5   :  { %p105_p0 = scmp.ne.s32.totalorder %s238_s0, %s104_s18  ;;  %p108_p1 = scmp.lt.u32.totalorder %s104_s18, %s238_s0 }
   0x7   :  { %p110_p2 = pnand %p108_p1, %p105_p0 }
   0x9   :  { %113 = shalt.err (!%p110_p2)
}
   0xa   :  { %s114_s23 = scalar_lea.vmem %s18_s13, 512  ;;  %p119_p4 = scmp.lt.s32.totalorder %s18_s13, %s18_s13 }
   0xb   :  { %p115_p3 = scmp.ne.s32.totalorder %s18_s13, %s114_s23  ;;  %p120_p5 = scmp.lt.s32.totalorder %s114_s23, %s114_s23 }
   0xd   :  { %p121_p6 = por %p120_p5, %p119_p4 }
   0xf   :  { %p122_p7 = pnand %p121_p6, %p115_p3 }
  0x11   :  { %125 = shalt.err (!%p122_p7)
}
  0x12   :  { %20 = dma.hbm_to_vmem [thread:$0]  %s238_s0, 512, %s18_s13, [#allocation3]  }
  0x13   :  { %s126_s28 = scalar_lea.hbm %s239_s1, 512 }
  0x14   :  { %p127_p8 = scmp.ne.s32.totalorder %s239_s1, %s126_s28  ;;  %p130_p9 = scmp.lt.u32.totalorder %s126_s28, %s239_s1 }
  0x16   :  { %p132_p10 = pnand %p130_p9, %p127_p8 }
  0x18   :  { %135 = shalt.err (!%p132_p10)
}
  0x19   :  { %s136_s6 = scalar_lea.vmem %s28_s15, 512  ;;  %p141_p12 = scmp.lt.s32.totalorder %s28_s15, %s28_s15 }
  0x1a   :  { %p137_p11 = scmp.ne.s32.totalorder %s28_s15, %s136_s6  ;;  %p142_p13 = scmp.lt.s32.totalorder %s136_s6, %s136_s6 }
  0x1c   :  { %p143_p0 = por %p142_p13, %p141_p12 }
  0x1e   :  { %p144_p1 = pnand %p143_p0, %p137_p11 }
  0x20   :  { %147 = shalt.err (!%p144_p1)
}
  0x21   :  { %30 = dma.hbm_to_vmem [thread:$0]  %s239_s1, 512, %s28_s15, [#allocation6]  }
  0x22   :  { %170 = dma.done.wait [#allocation3], 512  }
  0x23   :  { %171 = vsyncadd [#allocation3], 4294966784 }
  0x24   :  { %172 = dma.done.wait [#allocation6], 512  }
  0x25   :  { %173 = vsyncadd [#allocation6], 4294966784  ;;  %v53_v0 = vlaneseq  ;;  %v39_v6 = vld [vmem:[%s240_s2] sm:$0xf]  ;;  %v41_v11 = vld [vmem:[#allocation2 + $0x8] sm:$0xff]  ;;  %s178_s1 = smov [#allocation7]  }
  0x26   :  { %v40_v7 = vld [vmem:[#allocation2] sm:$0xff]  ;;  %v45_v12 = vld [vmem:[#allocation5 + $0x8] sm:$0xff]  ;;  %v42_v14 = vld [vmem:[#allocation2 + $0x10] sm:$0xff]  ;;  %s91_s2 = sshll.u32 %s178_s1, 4  ;;  %s92_s2 = int_to_ptr.vmem [resolvable:$true] %s91_s2 }
  0x27   :  { %v54_v1 = vshrl.u32 %v53_v0, 7  ;;  %v44_v8 = vld [vmem:[#allocation5] sm:$0xff]  ;;  %v49_v16 = vsub.f32 %v41_v11, %v45_v12  ;;  %v46_v17 = vld [vmem:[#allocation5 + $0x10] sm:$0xff]  ;;  %v43_v18 = vld [vmem:[#allocation2 + $0x18] sm:$0xff]  ;;  %s148_s10 = scalar_lea.vmem %s92_s2, 512  ;;  %p153_p3 = scmp.lt.s32.totalorder %s92_s2, %s92_s2 }
  0x28   :  { %v48_v9 = vsub.f32 %v40_v7, %v44_v8  ;;  %v47_v19 = vld [vmem:[#allocation5 + $0x18] sm:$0xff]  ;;  %v50_v22 = vsub.f32 %v42_v14, %v46_v17  ;;  %p149_p2 = scmp.ne.s32.totalorder %s92_s2, %s148_s10  ;;  %p154_p4 = scmp.lt.s32.totalorder %s148_s10, %s148_s10 }
  0x29   :  { %v55_v2 = vsub.s32 0, %v54_v1  ;;  %v59_v3 = vsub.s32 1, %v54_v1  ;;  %v63_v4 = vsub.s32 2, %v54_v1  ;;  %v67_v5 = vsub.s32 3, %v54_v1 }
  0x2a   :  { %v51_v23 = vsub.f32 %v43_v18, %v47_v19  ;;  %p155_p5 = por %p154_p4, %p153_p3 }
  0x2b   :  { %v56_v10 = vrot.slane %v39_v6, %v55_v2  ;;  %v60_v13 = vrot.slane %v39_v6, %v59_v3  ;;  %v64_v15 = vrot.slane %v39_v6, %v63_v4  ;;  %v68_v20 = vrot.slane %v39_v6, %v67_v5 }
  0x2c   :  { %p156_p6 = pnand %p155_p5, %p149_p2 }
  0x2d   :  { %v73_v21 = vmul.f32 %v56_v10, %v48_v9  ;;  %v74_v24 = vmul.f32 %v60_v13, %v49_v16  ;;  %v75_v26 = vmul.f32 %v64_v15, %v50_v22  ;;  %v76_v27 = vmul.f32 %v68_v20, %v51_v23 }
  0x2f   :  { %v77_v25 = vadd.f32 %v73_v21, %v44_v8  ;;  %v78_v28 = vadd.f32 %v74_v24, %v45_v12  ;;  %v79_v29 = vadd.f32 %v75_v26, %v46_v17  ;;  %v80_v30 = vadd.f32 %v76_v27, %v47_v19 }
  0x31   :  { %81 = vst [vmem:[#allocation7] sm:$0xff] %v77_v25  ;;  %82 = vst [vmem:[#allocation7 + $0x8] sm:$0xff] %v78_v28 }
  0x32   :  { %83 = vst [vmem:[#allocation7 + $0x10] sm:$0xff] %v79_v29  ;;  %84 = vst [vmem:[#allocation7 + $0x18] sm:$0xff] %v80_v30 }
  0x33   :  { %159 = shalt.err (!%p156_p6)
}
  0x34   :  { %s160_s13 = scalar_lea.hbm %s241_s3, 512 }
  0x35   :  { %p161_p7 = scmp.ne.s32.totalorder %s241_s3, %s160_s13  ;;  %p164_p8 = scmp.lt.u32.totalorder %s160_s13, %s241_s3 }
  0x37   :  { %p166_p9 = pnand %p164_p8, %p161_p7 }
  0x39   :  { %169 = shalt.err (!%p166_p9)
}
  0x3a   :  { %94 = dma.vmem_to_hbm [thread:$0]  %s92_s2, 512, %s241_s3, [#allocation4]  }
  0x3b   :  { %174 = dma.done.wait [#allocation4], 512  }
  0x3c   :  { %175 = vsyncadd [#allocation4], 4294966784 }
  0x3d   :  { %98 = vsyncpa [#allocation3], 1 }
  0x3e   :  { %99 = vsyncpa [#allocation6], 1 }
  0x3f   :  { %100 = vsyncpa [#allocation4], 1 }

</bundles_post_ra>
